<compile_context>
chip_gen: v7x
topology: tpu7x:2x2x1
jax: 0.10.0
libtpu: 0.0.40
codegen_flags: <defaults>
</compile_context>

<pallas_src>
import functools

import numpy as np

import jax
import jax.numpy as jnp
from jax import lax
from jax.experimental import pallas as pl
from jax.experimental.pallas import tpu as pltpu


# ---------------------------------------------------------------------------
# One-time probe: we need a shift primitive with out[i] = x[(i + q) mod N].
# pltpu.roll is an XLU rotate; probe its direction once so the kernel's shift
# amounts are correct regardless of the rotation convention.
# ---------------------------------------------------------------------------
@functools.lru_cache(maxsize=1)
def _roll_matches_jnp_roll():
    def probe(x_ref, o_ref):
        o_ref[...] = pltpu.roll(x_ref[...], shift=1, axis=1)

    x = jnp.broadcast_to(jnp.arange(128, dtype=jnp.float32)[None, :], (8, 128))
    out = pl.pallas_call(
        probe, out_shape=jax.ShapeDtypeStruct((8, 128), jnp.float32))(x)
    # jnp.roll(x, 1, axis=1)[0, 0] == x[0, -1] == 127
    return bool(float(out[0, 0]) == 127.0)


# ---------------------------------------------------------------------------
# Fused CEM kernel builder
# ---------------------------------------------------------------------------
def _make_fused_cem_kernel(*, s, inv_hTh, dfilt, ufilt, pre0, pre1, H, W, TBC,
                           roll_is_jnp):
    """Kernel: x3 block (TBC,H,W), phase-split gen block (s*s,TBC,H,W)
    -> phase-split output block (s*s,TBC,H,W)."""
    K1, K2 = int(inv_hTh.shape[0]), int(dfilt.shape[0])
    p1, p2 = K1 // 2, K2 // 2
    R2 = TBC * H
    assert H > max(p1, p2) and W > max(p1, p2), "filters larger than the tile"

    # Bake filter taps in as Python constants (no SMEM scalar loads).
    inv_c = [[float(inv_hTh[i, j]) for j in range(K1)] for i in range(K1)]
    df_c = [[float(dfilt[i, j]) for j in range(K2)] for i in range(K2)]
    uf_c = [[float(ufilt[i, j]) for j in range(K2)] for i in range(K2)]

    def _shift(x2, q, axis):
        # out[..., i, ...] = x2[..., (i + q) mod n, ...]   (wrap fixed by caller)
        n = x2.shape[axis]
        amt = ((-q) % n) if roll_is_jnp else (q % n)
        if amt == 0:
            return x2
        return pltpu.roll(x2, shift=amt, axis=axis)

    def kernel(x_ref, g_ref, o_ref):
        f32 = jnp.float32
        zeros2 = jnp.zeros((R2, W), f32)
        # row index within each channel block / lane index (hoisted once)
        row_in_blk = lax.broadcasted_iota(jnp.int32, (R2, W), 0) % H
        col_ids = lax.broadcasted_iota(jnp.int32, (R2, W), 1)

        def make_windower(phases3, s_ph):
            """phases3: dict (phase_r, phase_c) -> (TBC,H,W) f32 value, or None
            meaning identically zero (zero-insertion phases).  Returns
            window(mr, mc, q, p) = replication-clamped, phase-selected shifted
            window of the underlying HR image, as a (TBC*H, W) value (or None
            if provably all-zero).  Row/full-window results are cached."""
            row_cache, full_cache = {}, {}

            def row_shift(mr, mc, q):
                key = (mr, mc, q)
                if key in row_cache:
                    return row_cache[key]
                center = phases3.get((mr, mc))
                top = phases3.get((0, mc))
                bot = phases3.get((s_ph - 1, mc))
                if q == 0:
                    out = None if center is None else center.reshape(R2, W)
                elif (center is None and
                      ((q < 0 and top is None) or (q > 0 and bot is None))):
                    out = None
                else:
                    base = (zeros2 if center is None
                            else _shift(center.reshape(R2, W), q, axis=0))
                    if q < 0:
                        if top is not None:
                            rep = jnp.broadcast_to(top[:, 0:1, :],
                                                   (TBC, H, W)).reshape(R2, W)
                            base = jnp.where(row_in_blk < -q, rep, base)
                        else:   # wrapped garbage -> true zeros
                            base = jnp.where(row_in_blk < -q, zeros2, base)
                    else:       # q > 0
                        if bot is not None:
                            rep = jnp.broadcast_to(bot[:, H - 1:H, :],
                                                   (TBC, H, W)).reshape(R2, W)
                            base = jnp.where(row_in_blk >= H - q, rep, base)
                        else:
                            base = jnp.where(row_in_blk >= H - q, zeros2, base)
                    out = base
                row_cache[key] = out
                return out

            def window(mr, mc, q, p):
                key = (mr, mc, q, p)
                if key in full_cache:
                    return full_cache[key]
                a_c = row_shift(mr, mc, q)
                if p == 0:
                    out = a_c
                else:
                    a_l = row_shift(mr, 0, q) if p < 0 else None
                    a_r = row_shift(mr, s_ph - 1, q) if p > 0 else None
                    if a_c is None and a_l is None and a_r is None:
                        out = None
                    else:
                        base = zeros2 if a_c is None else _shift(a_c, p, axis=1)
                        if p < 0:
                            if a_l is not None:
                                rep = jnp.broadcast_to(a_l[:, 0:1], (R2, W))
                                base = jnp.where(col_ids < -p, rep, base)
                            else:
                                base = jnp.where(col_ids < -p, zeros2, base)
                        else:   # p > 0
                            if a_r is not None:
                                rep = jnp.broadcast_to(a_r[:, W - 1:W], (R2, W))
                                base = jnp.where(col_ids >= W - p, rep, base)
                            else:
                                base = jnp.where(col_ids >= W - p, zeros2, base)
                        out = base
                full_cache[key] = out
                return out

            return window

        # ---- Stage A: DownscaleOP(gen) fully fused (replication pad +
        #      antialias conv + stride-s subsample) on the gen phase images. ----
        gph = {(ar, ac): g_ref[ar * s + ac].astype(f32)
               for ar in range(s) for ac in range(s)}
        win_g = make_windower(gph, s)
        down = None
        for ki in range(K2):
            dr = pre0 + ki - p2
            mr, q = dr % s, dr // s
            for kj in range(K2):
                coef = df_c[ki][kj]
                if coef == 0.0:
                    continue
                dc = pre1 + kj - p2
                mc, p = dc % s, dc // s
                w = win_g(mr, mc, q, p)
                if w is None:
                    continue
                term = coef * w
                down = term if down is None else down + term
        if down is None:
            down = zeros2

        # ---- Stage B: ONE inv_hTh conv on (x - down)  (linearity fusion). ----
        x2 = x_ref[...].astype(f32).reshape(R2, W)
        e3 = (x2 - down).reshape(TBC, H, W)
        win_e = make_windower({(0, 0): e3}, 1)
        t = None
        for ki in range(K1):
            q = ki - p1
            for kj in range(K1):
                coef = inv_c[ki][kj]
                if coef == 0.0:
                    continue
                p = kj - p1
                w = win_e(0, 0, q, p)
                term = coef * w
                t = term if t is None else t + term
        if t is None:
            t = zeros2

        # ---- Stage C: polyphase Upscale_OP(t) combined with gen, per output
        #      phase, written directly to o_ref (no stack epilogue). ----
        d3 = t.reshape(TBC, H, W)
        dph = {(ar, ac): (d3 if (ar == pre0 and ac == pre1) else None)
               for ar in range(s) for ac in range(s)}
        win_d = make_windower(dph, s)
        # TODO(synk): border-only taps still do full-frame FMAs on windows whose
        # nonzero support is a K2//2-wide strip.
        for r in range(s):
            for cph in range(s):
                acc = g_ref[r * s + cph].astype(f32).reshape(R2, W)
                for ki in range(K2):
                    dr = r + ki - p2
                    mr, q = dr % s, dr // s
                    for kj in range(K2):
                        coef = uf_c[ki][kj]
                        if coef == 0.0:
                            continue
                        dc = cph + kj - p2
                        mc, p = dc % s, dc // s
                        w = win_d(mr, mc, q, p)
                        if w is None:     # static polyphase zero-tap skip
                            continue
                        acc = acc + coef * w
                o_ref[r * s + cph] = acc.reshape(TBC, H, W).astype(o_ref.dtype)

    return kernel


# ---------------------------------------------------------------------------
# VMEM budgeting / block sizing (per TPU generation)
# ---------------------------------------------------------------------------
def _vmem_limit_bytes():
    cap = 64 * 1024 * 1024          # conservative fallback (v7x-sized)
    try:
        info = pltpu.get_tpu_info()
        cap = int(getattr(info, "vmem_capacity_bytes", cap))
    except Exception:
        pass
    # ~48 MiB on v7x (64 MiB physical), ~96 MiB on v5e/v6e (128 MiB physical)
    return min(max(cap * 3 // 4, 32 * 1024 * 1024), 100 * 1024 * 1024)


def _pick_tbc(BC, H, W, s, K1, K2, budget_bytes):
    """Channels per block: as large as the budget allows, counting in-kernel
    temporaries, while keeping >=2 (preferably even) grid steps so a
    2-TensorCore chip can split the 'parallel' axis."""
    io_per_ch = 4 * H * W * (1 + 2 * s * s) * 2            # x + gen + out, double-buffered
    tmp_per_ch = 4 * H * W * (3 * s * s + 2 * max(K1, K2) + 8)  # caches/accumulators
    per_ch = io_per_ch + tmp_per_ch
    max_tbc = max(1, budget_bytes // per_ch)
    divisors = [d for d in range(1, BC + 1) if BC % d == 0 and d <= max_tbc] or [1]
    multi = [d for d in divisors if BC // d >= 2]
    if multi:
        even = [d for d in multi if (BC // d) % 2 == 0]
        return max(even) if even else max(multi)
    return max(divisors)


def _cem_fused_pallas(x3f, gen_ps, inv_hTh, dfilt, ufilt, *, s, pre, roll_is_jnp):
    """x3f: (BC,H,W), gen_ps: (s*s,BC,H,W) phase-split gen -> (s*s,BC,H,W)."""
    BC, H, W = x3f.shape
    s2 = s * s
    K1, K2 = int(inv_hTh.shape[0]), int(dfilt.shape[0])
    assert K1 % 2 == 1 and K2 % 2 == 1, "odd 'same' filters assumed (as in CEMnet)"

    vmem_limit = _vmem_limit_bytes()
    TBC = _pick_tbc(BC, H, W, s, K1, K2, budget_bytes=int(vmem_limit * 0.6))
    grid = (BC // TBC,)

    kernel = _make_fused_cem_kernel(
        s=s, inv_hTh=np.asarray(inv_hTh, np.float32),
        dfilt=np.asarray(dfilt, np.float32), ufilt=np.asarray(ufilt, np.float32),
        pre0=int(pre[0]), pre1=int(pre[1]), H=H, W=W, TBC=TBC,
        roll_is_jnp=roll_is_jnp)

    return pl.pallas_call(
        kernel,
        out_shape=jax.ShapeDtypeStruct((s2, BC, H, W), x3f.dtype),
        grid_spec=pltpu.PrefetchScalarGridSpec(
            num_scalar_prefetch=0,
            grid=grid,
            in_specs=[
                pl.BlockSpec((TBC, H, W), lambda n: (n, 0, 0)),
                pl.BlockSpec((s2, TBC, H, W), lambda n: (0, n, 0, 0)),
            ],
            out_specs=pl.BlockSpec((s2, TBC, H, W), lambda n: (0, n, 0, 0)),
        ),
        compiler_params=pltpu.CompilerParams(
            dimension_semantics=("parallel",),
            vmem_limit_bytes=vmem_limit,
        ),
    )(x3f, gen_ps)


# ---------------------------------------------------------------------------
# CEM_PyTorch equivalent
# ---------------------------------------------------------------------------
class CEMPallas:
    def __init__(self, ds_factor, inv_hTh, ds_kernel):
        self.s = int(ds_factor)
        self.inv_hTh = np.asarray(inv_hTh, np.float32)                     # [K1,K1]
        self.ds_kernel = np.asarray(ds_kernel, np.float32)                 # [K2,K2]
        # calc_strides(None, ds_factor): LR sample offset inside each s x s block
        self.pre = ((self.s - 1) // 2, (self.s - 1) // 2)
        self.upscale_filter = self.ds_kernel * float(self.s ** 2)          # upscale_antialiasing
        self.downscale_filter = np.rot90(self.ds_kernel, 2).copy()         # downscale_antialiasing
        self._roll_is_jnp = _roll_matches_jnp_roll()

    def generated_image_model(self, x):
        # TODO(synk): the real generator is an injected external nn.Module (SR
        # network); deterministic nearest-neighbour x{s} upsampler stand-in.
        x3 = x[:, -3:, :, :]
        return jnp.repeat(jnp.repeat(x3, self.s, axis=2), self.s, axis=3)

    def forward(self, x):
        s = self.s
        gen = self.generated_image_model(x)          # [B,3,sH,sW]
        x3 = x[:, -3:, :, :]
        B, C, H, W = x3.shape
        assert gen.shape[2] % s == 0 and gen.shape[3] % s == 0
        BC = B * C
        # TODO(synk): these two XLA transposes are the remaining extra HBM round
        # trips (phase split of gen / merge of the output); fold them into the
        # kernel (strided ref I/O or in-VMEM interleave) to halve HBM traffic.
        gen_ps = (gen.reshape(BC, H, s, W, s)
                     .transpose(2, 4, 0, 1, 3)
                     .reshape(s * s, BC, H, W))
        x3f = x3.reshape(BC, H, W)
        out_ps = _cem_fused_pallas(x3f, gen_ps, self.inv_hTh,
                                   self.downscale_filter, self.upscale_filter,
                                   s=s, pre=self.pre,
                                   roll_is_jnp=self._roll_is_jnp)
        out = (out_ps.reshape(s, s, BC, H, W)
                     .transpose(2, 3, 0, 4, 1)
                     .reshape(B, C, s * H, s * W))
        # conf.sigmoid_range_limit == False -> no tanh scaling of the NS component.
        return out


# ---------------------------------------------------------------------------
# Pure-JAX reference (mirrors the original module structure) for verification
# ---------------------------------------------------------------------------
def _ref_conv(x, filt):
    B, C, H, W = x.shape
    K = int(filt.shape[0])
    p = K // 2
    xp = jnp.pad(x, ((0, 0), (0, 0), (p, p), (p, p)), mode='edge')
    out = jnp.zeros_like(x)
    for ki in range(K):
        for kj in range(K):
            out = out + filt[ki, kj] * xp[:, :, ki:ki + H, kj:kj + W]
    return out


def _ref_forward(cem, x):
    s, pre = cem.s, cem.pre
    gen = cem.generated_image_model(x)
    x3 = x[:, -3:, :, :]

    def up(t):
        B, C, Hh, Ww = t.shape
        z = jnp.zeros((B, C, Hh, s, Ww, s), t.dtype)
        z = z.at[:, :, :, pre[0], :, pre[1]].set(t).reshape(B, C, Hh * s, Ww * s)
        return _ref_conv(z, cem.upscale_filter)

    def down(t):
        y = _ref_conv(t, cem.downscale_filter)
        B, C, Hh, Ww = y.shape
        return y.reshape(B, C, Hh // s, s, Ww // s, s)[:, :, :, pre[0], :, pre[1]]

    ortho_hr = up(_ref_conv(x3, cem.inv_hTh))
    ortho_gen = up(_ref_conv(down(gen), cem.inv_hTh))
    return ortho_hr + gen - ortho_gen


# ---------------------------------------------------------------------------
if __name__ == "__main__":
    key = jax.random.PRNGKey(0)
    k_x, k_f1, k_f2 = jax.random.split(key, 3)

    # Small but lane-dense shapes: B=2, C=3 (module is hard-wired to 3-channel
    # images), H=16, W=128 (last dim a full 128-lane vreg), scale=2.
    B, C, H, W = 2, 3, 16, 128
    ds_factor = 2
    K1 = 5   # inv_hTh filter size (odd, centered after CEMnet.compute_inv_hTh)
    K2 = 5   # ds_kernel size (odd so the module's 'same' conv arithmetic holds)

    x = jax.random.uniform(k_x, (B, C, H, W), jnp.float32)

    # Deterministic synthetic filters (CEMnet precomputes these from the SR
    # kernel / FFT; synthetic stand-ins with the correct shapes / roles).
    inv_hTh = jax.random.normal(k_f1, (K1, K1), jnp.float32) * 0.05
    inv_hTh = inv_hTh.at[K1 // 2, K1 // 2].add(1.0)          # peaked deconvolution-like filter
    ds_kernel = jax.random.uniform(k_f2, (K2, K2), jnp.float32)
    ds_kernel = ds_kernel / jnp.sum(ds_kernel) / float(ds_factor ** 2)   # low-pass, sums to 1/s^2

    cem = CEMPallas(ds_factor, np.asarray(inv_hTh), np.asarray(ds_kernel))

    out = jax.block_until_ready(jax.jit(cem.forward)(x))
    assert out.shape == (B, 3, ds_factor * H, ds_factor * W), out.shape

    ref = jax.block_until_ready(_ref_forward(cem, x))
    assert bool(jnp.all(jnp.isfinite(out)))
    max_err = float(jnp.max(jnp.abs(out - ref)))
    assert bool(jnp.allclose(out, ref, rtol=1e-4, atol=1e-4)), max_err

    print("KERNEL_OK")
</pallas_src>

<mosaic_0001>
module attributes {stable_mosaic.version = 11 : i64} {
  func.func @probe(%arg0: memref<8x128xf32, #tpu.memory_space<vmem>>, %arg1: memref<8x128xf32, #tpu.memory_space<vmem>>) attributes {dimension_semantics = [], scalar_prefetch = 0 : i64, scratch_operands = 0 : i64, tpu.core_type = #tpu.core_type<tc>} {
    %c0 = arith.constant 0 : index
    %c0_0 = arith.constant 0 : index
    %0 = vector.load %arg0[%c0, %c0_0] : memref<8x128xf32, #tpu.memory_space<vmem>>, vector<8x128xf32>
    %c1_i32 = arith.constant 1 : i32
    %1 = tpu.dynamic_rotate %0 by %c1_i32 dim 1 : vector<8x128xf32>, i32 -> vector<8x128xf32>
    %c0_1 = arith.constant 0 : index
    %c0_2 = arith.constant 0 : index
    %2 = vector.load %arg1[%c0_1, %c0_2] : memref<8x128xf32, #tpu.memory_space<vmem>>, vector<8x128xf32>
    tpu.vector_store %arg1[%c0_1, %c0_2], %1 {strides = array<i32>} : memref<8x128xf32, #tpu.memory_space<vmem>>, vector<8x128xf32>,
    return
  }
}

</mosaic_0001>

<bundles_post_ra>
// kernel: tpu_custom_call.1
= control target key start
LH: loop header
LB: loop body
LE: loop exit
PB: predicated region body
PF: predicated region fallthrough
CT: control target
= control target key end

     0   :  { %6 = vsyncpa [#allocation3], 0  ;;  %s128_s0 = inlined_call_operand.hbm [shape: f32[8,128], index: 0, kind: input, shape index: {}]   ;;  %s129_s1 = inlined_call_operand.hbm [shape: f32[8,128], index: 1, kind: output, shape index: {}]  }
   0x1   :  { %7 = vsyncpa [#allocation4], 0  ;;  %s91_s6 = smov [#allocation2]   ;;  %s43_s10 = scalar_lea.hbm %s128_s0, 128 }
   0x2   :  { %s14_s7 = sshll.u32 %s91_s6, 4  ;;  %p44_p0 = scmp.ne.s32.totalorder %s128_s0, %s43_s10  ;;  %s15_s7 = int_to_ptr.vmem [resolvable:$true] %s14_s7 }
   0x3   :  { %p47_p1 = scmp.lt.u32.totalorder %s43_s10, %s128_s0 }
   0x5   :  { %p49_p2 = pnand %p47_p1, %p44_p0 }
   0x7   :  { %52 = shalt.err (!%p49_p2)
}
   0x8   :  { %s53_s15 = scalar_lea.vmem %s15_s7, 128  ;;  %p58_p4 = scmp.lt.s32.totalorder %s15_s7, %s15_s7 }
   0x9   :  { %p54_p3 = scmp.ne.s32.totalorder %s15_s7, %s53_s15  ;;  %p59_p5 = scmp.lt.s32.totalorder %s53_s15, %s53_s15 }
   0xb   :  { %p60_p6 = por %p59_p5, %p58_p4 }
   0xd   :  { %p61_p7 = pnand %p60_p6, %p54_p3 }
   0xf   :  { %64 = shalt.err (!%p61_p7)
}
  0x10   :  { %17 = dma.hbm_to_vmem [thread:$0]  %s128_s0, 128, %s15_s7, [#allocation3]  }
  0x11   :  { %87 = dma.done.wait [#allocation3], 128  }
  0x12   :  { %88 = vsyncadd [#allocation3], 4294967168  ;;  %v21_v0 = vld [vmem:[#allocation2] sm:$0xff]  ;;  %s92_s18 = smov 1   ;;  %s93_s19 = smov [#allocation5]  }
  0x13   :  { %22 = vrot.lane.b32.xlu0 %v21_v0, %s92_s18  ;;  %s31_s20 = sshll.u32 %s93_s19, 4  ;;  %s32_s20 = int_to_ptr.vmem [resolvable:$true] %s31_s20 }
  0x14   :  { %s65_s21 = scalar_lea.vmem %s32_s20, 128  ;;  %p70_p9 = scmp.lt.s32.totalorder %s32_s20, %s32_s20 }
  0x15   :  { %p66_p8 = scmp.ne.s32.totalorder %s32_s20, %s65_s21  ;;  %p71_p10 = scmp.lt.s32.totalorder %s65_s21, %s65_s21 }
  0x17   :  { %p72_p11 = por %p71_p10, %p70_p9 }
  0x19   :  { %p73_p12 = pnand %p72_p11, %p66_p8 }
  0x85   :  { %v23_v1 = vpop.permute.xlu0 %22 }
  0x86   :  { %24 = vst [vmem:[#allocation5] sm:$0xff] %v23_v1 }
  0x87   :  { %76 = shalt.err (!%p73_p12)
}
  0x88   :  { %s77_s0 = scalar_lea.hbm %s129_s1, 128 }
  0x89   :  { %p78_p13 = scmp.ne.s32.totalorder %s129_s1, %s77_s0  ;;  %p81_p0 = scmp.lt.u32.totalorder %s77_s0, %s129_s1 }
  0x8b   :  { %p83_p1 = pnand %p81_p0, %p78_p13 }
  0x8d   :  { %86 = shalt.err (!%p83_p1)
}
  0x8e   :  { %34 = dma.vmem_to_hbm [thread:$0]  %s32_s20, 128, %s129_s1, [#allocation4]  }
  0x8f   :  { %89 = dma.done.wait [#allocation4], 128  }
  0x90   :  { %90 = vsyncadd [#allocation4], 4294967168 }
  0x91   :  { %38 = vsyncpa [#allocation3], 1 }
  0x92   :  { %39 = vsyncpa [#allocation4], 1 }

</bundles_post_ra>
